<compile_context>
chip_gen: v7x
topology: tpu7x:2x2x1
jax: 0.10.0
libtpu: 0.0.40
codegen_flags: <defaults>
</compile_context>

<pallas_src>
import functools
import math

import jax
import jax.numpy as jnp
from jax.experimental import pallas as pl
from jax.experimental.pallas import tpu as pltpu


def _round_up(n: int, m: int) -> int:
    return ((n + m - 1) // m) * m


def _pick_row_block(tile_s: int) -> int:
    """Largest-value-near-sqrt(tile_s) multiple of 8 that divides tile_s."""
    target = math.sqrt(tile_s)
    best = 8
    for cand in range(8, tile_s + 1, 8):
        if tile_s % cand == 0 and abs(cand - target) < abs(best - target):
            best = cand
    return best


def _rope_iota_kernel(inv_ref, cos_ref, sin_ref, *, row_block: int):
    # inv_ref: [1, dim] f32 (pre-duplicated inv_freq); cos/sin_ref: [tile_s, dim]
    tile_s, dim = cos_ref.shape
    r_blk = row_block
    q_blk = tile_s // r_blk

    inv = inv_ref[...]                                             # [1, dim]
    base = (pl.program_id(0) * tile_s).astype(jnp.float32)

    # Fine angles: r * inv_freq for r in [0, r_blk)
    r_idx = jax.lax.broadcasted_iota(jnp.int32, (r_blk, dim), 0).astype(jnp.float32)
    fine = r_idx * inv                                             # [r_blk, dim]
    cf = jnp.cos(fine)
    sf = jnp.sin(fine)

    # Coarse angles: (base + q*r_blk) * inv_freq for q in [0, q_blk)
    q_idx = jax.lax.broadcasted_iota(jnp.int32, (q_blk, dim), 0).astype(jnp.float32)
    coarse = (base + q_idx * float(r_blk)) * inv                   # [q_blk, dim]
    cc = jnp.cos(coarse)
    sc = jnp.sin(coarse)

    # Combine with angle-addition identities; static (unrolled) loop over the
    # q row-blocks, each doing full-lane-width stores of r_blk rows.
    for q in range(q_blk):
        ccq = cc[q:q + 1, :]                                       # [1, dim]
        scq = sc[q:q + 1, :]
        lo = q * r_blk
        cos_ref[lo:lo + r_blk, :] = (ccq * cf - scq * sf).astype(cos_ref.dtype)
        sin_ref[lo:lo + r_blk, :] = (scq * cf + ccq * sf).astype(sin_ref.dtype)


def _rope_iota_packed_kernel(inv_ref, phase_ref, out_ref, *, row_block: int):
    # inv_ref/phase_ref: [1, 2*dim]; out_ref: [tile_s, 2*dim] = cos || sin
    # (sin is obtained as cos(angle - pi/2) via the phase row).
    tile_s, width = out_ref.shape
    r_blk = row_block
    q_blk = tile_s // r_blk

    inv = inv_ref[...]                                             # [1, width]
    phase = phase_ref[...]                                         # [1, width]
    base = (pl.program_id(0) * tile_s).astype(jnp.float32)

    r_idx = jax.lax.broadcasted_iota(jnp.int32, (r_blk, width), 0).astype(jnp.float32)
    fine = r_idx * inv - phase                                     # [r_blk, width]
    cf = jnp.cos(fine)
    sf = jnp.sin(fine)

    q_idx = jax.lax.broadcasted_iota(jnp.int32, (q_blk, width), 0).astype(jnp.float32)
    coarse = (base + q_idx * float(r_blk)) * inv                   # [q_blk, width]
    cc = jnp.cos(coarse)
    sc = jnp.sin(coarse)

    for q in range(q_blk):
        ccq = cc[q:q + 1, :]
        scq = sc[q:q + 1, :]
        lo = q * r_blk
        out_ref[lo:lo + r_blk, :] = (ccq * cf - scq * sf).astype(out_ref.dtype)


def _rope_pos_kernel(pos_ref, inv_ref, cos_ref, sin_ref):
    # Explicit position_ids path (minor).  pos_ref: [tile_s, 1] f32,
    # inv_ref: [1, dim] (pre-duplicated) -> no concat, full-width stores.
    freqs = pos_ref[...] * inv_ref[...]                            # [tile_s, dim]
    cos_ref[...] = jnp.cos(freqs).astype(cos_ref.dtype)
    sin_ref[...] = jnp.sin(freqs).astype(sin_ref.dtype)


class RotaryEmbedding:
    """JAX/Pallas port of the PyTorch RotaryEmbedding module."""

    def __init__(self, dim: int, max_position: int = 2048, base: int = 10000,
                 out_dtype=jnp.float32, tile_s: int = 2048):
        self.dim = dim
        self.max_position = max_position
        self.base = base
        self.out_dtype = out_dtype
        self.max_tile_s = tile_s  # should be a multiple of 16

        # inv_freq: [dim // 2], same formula as the torch buffer.
        inv_half = 1.0 / (base ** (jnp.arange(0, dim, 2, dtype=jnp.float32) / dim))
        self.inv_freq = inv_half
        # Pre-duplicated full-width row (emb = cat((freqs, freqs), -1)).
        inv_full = jnp.concatenate([inv_half, inv_half])
        self.inv_full = inv_full.reshape(1, dim)
        # Packed (cos||sin) tables: cos(x - 0) | cos(x - pi/2) == sin(x).
        self.inv_packed = jnp.concatenate([inv_full, inv_full]).reshape(1, 2 * dim)
        self.phase = jnp.concatenate(
            [jnp.zeros((dim,), jnp.float32),
             jnp.full((dim,), math.pi / 2, jnp.float32)]
        ).reshape(1, 2 * dim)

    def _choose_tile_s(self, s: int) -> int:
        if s <= 16:
            return _round_up(s, 8)
        itemsize = jnp.dtype(self.out_dtype).itemsize
        # 2 outputs x 2 pipeline buffers per step (packed path has 1 output of
        # double width -> same byte count).
        bytes_per_row = 2 * 2 * self.dim * itemsize
        budget = 24 * 1024 * 1024     # headroom under 32 MiB scoped-VMEM default
        cap = max(16, budget // max(bytes_per_row, 1))
        # Aim for >= 4 grid steps so v7x's two TensorCores both get work and
        # compute/writeback pipelining has something to overlap.
        target = max(16, -(-s // 4))
        tile = min(self.max_tile_s, cap, target, s)
        tile = max(16, (tile // 16) * 16)   # multiple of 16 (bf16-native sublanes)
        return tile

    def __call__(self, x, position_ids=None, packed=False):
        seq_len = x.shape[1]
        use_iota = position_ids is None
        if use_iota:
            s = seq_len
        else:
            position_ids = jnp.asarray(position_ids)
            # TODO(synk): support HF-style [batch, seq] position_ids.
            assert position_ids.ndim == 1, "position_ids must be 1-D [seq]"
            assert not packed, "packed layout only supported on the default path"
            s = position_ids.shape[0]

        tile_s = self._choose_tile_s(s)
        grid = (pl.cdiv(s, tile_s),)
        cparams = pltpu.CompilerParams(dimension_semantics=("parallel",))
        inv_spec = pl.BlockSpec((1, self.dim), lambda i: (0, 0))

        if use_iota:
            r_blk = _pick_row_block(tile_s)
            assert tile_s % r_blk == 0

            if packed:
                width = 2 * self.dim
                table_spec = pl.BlockSpec((1, width), lambda i: (0, 0))
                return pl.pallas_call(
                    functools.partial(_rope_iota_packed_kernel, row_block=r_blk),
                    out_shape=jax.ShapeDtypeStruct((s, 1, width), self.out_dtype),
                    grid=grid,
                    in_specs=[table_spec, table_spec],
                    out_specs=pl.BlockSpec((tile_s, None, width),
                                           lambda i: (i, 0, 0)),
                    compiler_params=cparams,
                )(self.inv_packed, self.phase)

            out_shape = (
                jax.ShapeDtypeStruct((s, 1, self.dim), self.out_dtype),
                jax.ShapeDtypeStruct((s, 1, self.dim), self.out_dtype),
            )
            out_specs = (
                pl.BlockSpec((tile_s, None, self.dim), lambda i: (i, 0, 0)),
                pl.BlockSpec((tile_s, None, self.dim), lambda i: (i, 0, 0)),
            )
            cos, sin = pl.pallas_call(
                functools.partial(_rope_iota_kernel, row_block=r_blk),
                out_shape=out_shape,
                grid=grid,
                in_specs=[inv_spec],
                out_specs=out_specs,
                compiler_params=cparams,
            )(self.inv_full)
            return cos, sin

        # Explicit position_ids path (f32 positions exact up to 2^24).
        pos2d = position_ids.astype(jnp.float32).reshape(s, 1)
        pos_spec = pl.BlockSpec((tile_s, 1), lambda i: (i, 0))
        out_shape = (
            jax.ShapeDtypeStruct((s, 1, self.dim), self.out_dtype),
            jax.ShapeDtypeStruct((s, 1, self.dim), self.out_dtype),
        )
        out_specs = (
            pl.BlockSpec((tile_s, None, self.dim), lambda i: (i, 0, 0)),
            pl.BlockSpec((tile_s, None, self.dim), lambda i: (i, 0, 0)),
        )
        cos, sin = pl.pallas_call(
            _rope_pos_kernel,
            out_shape=out_shape,
            grid=grid,
            in_specs=[pos_spec, inv_spec],
            out_specs=out_specs,
            compiler_params=cparams,
        )(pos2d, self.inv_full)
        return cos, sin


def _reference(dim, base, x, position_ids=None, max_position=2048):
    """Pure-JAX reference reproducing the PyTorch semantics (f32 cache)."""
    seq_len = x.shape[1]
    if position_ids is None:
        position_ids = jnp.arange(seq_len)
    inv_freq = 1.0 / (base ** (jnp.arange(0, dim, 2, dtype=jnp.float32) / dim))
    t = jnp.arange(max_position, dtype=jnp.float32)
    freqs = jnp.einsum("i,j->ij", t, inv_freq)
    emb = jnp.concatenate([freqs, freqs], axis=-1)
    cos = jnp.cos(emb)[position_ids][:, None, :]
    sin = jnp.sin(emb)[position_ids][:, None, :]
    return cos, sin


if __name__ == "__main__":
    batch, seq, hidden = 2, 8, 32
    dim = hidden

    key = jax.random.PRNGKey(0)
    x = jax.random.normal(key, (batch, seq, hidden), dtype=jnp.float32)

    rope = RotaryEmbedding(dim=dim, max_position=2048, base=10000)

    # Tolerance: both kernel and reference evaluate angles in f32; the
    # two-level angle split differs from direct evaluation by ~|angle|*2^-24.
    ATOL, RTOL = 1e-4, 1e-5

    # Default path (in-kernel iota positions, angle-addition split).
    cos, sin = jax.block_until_ready(rope(x))
    cos_r, sin_r = _reference(dim, 10000, x)
    assert cos.shape == (seq, 1, dim) and sin.shape == (seq, 1, dim)
    assert jnp.allclose(cos, cos_r, atol=ATOL, rtol=RTOL)
    assert jnp.allclose(sin, sin_r, atol=ATOL, rtol=RTOL)

    # Explicit position_ids path.
    pids = jnp.array([3, 0, 5, 7, 1, 2, 6, 4], dtype=jnp.int32)
    cos_p, sin_p = jax.block_until_ready(rope(x, pids))
    cos_pr, sin_pr = _reference(dim, 10000, x, pids)
    assert jnp.allclose(cos_p, cos_pr, atol=ATOL, rtol=RTOL)
    assert jnp.allclose(sin_p, sin_pr, atol=ATOL, rtol=RTOL)

    # Multi-step grid with a partial boundary block (300 = 4*64 + 44).
    seq2 = 300
    x2 = jax.random.normal(key, (1, seq2, hidden), dtype=jnp.float32)
    cos2, sin2 = jax.block_until_ready(rope(x2))
    cos2_r, sin2_r = _reference(dim, 10000, x2)
    assert cos2.shape == (seq2, 1, dim)
    assert jnp.allclose(cos2, cos2_r, atol=ATOL, rtol=RTOL)
    assert jnp.allclose(sin2, sin2_r, atol=ATOL, rtol=RTOL)

    # Packed (lane-dense) layout: single [S, 1, 2*dim] array holding cos||sin.
    packed = jax.block_until_ready(rope(x2, packed=True))
    assert packed.shape == (seq2, 1, 2 * dim)
    assert jnp.allclose(packed[..., :dim], cos2_r, atol=ATOL, rtol=RTOL)
    assert jnp.allclose(packed[..., dim:], sin2_r, atol=ATOL, rtol=RTOL)

    print("KERNEL_OK")
</pallas_src>

<mosaic_0001>
module attributes {stable_mosaic.version = 11 : i64} {
  func.func @_rope_iota_kernel(%arg0: i32, %arg1: memref<1x32xf32, #tpu.memory_space<vmem>>, %arg2: memref<8x1x32xf32, #tpu.memory_space<vmem>>, %arg3: memref<8x1x32xf32, #tpu.memory_space<vmem>>) attributes {dimension_semantics = [#tpu.dimension_semantics<parallel>], iteration_bounds = array<i64: 1>, scalar_prefetch = 0 : i64, scratch_operands = 0 : i64, tpu.core_type = #tpu.core_type<tc>, window_params = [{pipeline_mode = #tpu.pipeline_mode<synchronous>, transform_indices = @transform_0, window_bounds = array<i64: 1, 32>}, {transform_indices = @transform_1, window_bounds = array<i64: 8, 1, 32>}, {transform_indices = @transform_2, window_bounds = array<i64: 8, 1, 32>}]} {
    %c0 = arith.constant 0 : index
    %c0_0 = arith.constant 0 : index
    %0 = vector.load %arg1[%c0, %c0_0] : memref<1x32xf32, #tpu.memory_space<vmem>>, vector<1x32xf32>
    %c8_i32 = arith.constant 8 : i32
    %1 = arith.muli %arg0, %c8_i32 : i32
    %2 = arith.sitofp %1 : i32 to f32
    %3 = tpu.iota {dimensions = array<i32: 0>} : vector<8x32xi32>
    %4 = arith.sitofp %3 : vector<8x32xi32> to vector<8x32xf32>
    %5 = vector.broadcast %0 : vector<1x32xf32> to vector<8x32xf32>
    %6 = arith.mulf %4, %5 : vector<8x32xf32>
    %7 = math.cos %6 : vector<8x32xf32>
    %8 = math.sin %6 : vector<8x32xf32>
    %9 = tpu.iota {dimensions = array<i32: 0>} : vector<1x32xi32>
    %10 = arith.sitofp %9 : vector<1x32xi32> to vector<1x32xf32>
    %cst = arith.constant 8.000000e+00 : f32
    %11 = vector.broadcast %cst : f32 to vector<1x32xf32>
    %12 = arith.mulf %10, %11 : vector<1x32xf32>
    %13 = vector.broadcast %2 : f32 to vector<1x32xf32>
    %14 = arith.addf %13, %12 : vector<1x32xf32>
    %15 = arith.mulf %14, %0 : vector<1x32xf32>
    %16 = math.cos %15 : vector<1x32xf32>
    %17 = math.sin %15 : vector<1x32xf32>
    %18 = vector.broadcast %16 : vector<1x32xf32> to vector<8x32xf32>
    %19 = arith.mulf %18, %7 : vector<8x32xf32>
    %20 = vector.broadcast %17 : vector<1x32xf32> to vector<8x32xf32>
    %21 = arith.mulf %20, %8 : vector<8x32xf32>
    %22 = arith.subf %19, %21 : vector<8x32xf32>
    %c0_1 = arith.constant 0 : index
    %c0_2 = arith.constant 0 : index
    %c0_3 = arith.constant 0 : index
    %23 = vector.load %arg2[%c0_1, %c0_2, %c0_3] : memref<8x1x32xf32, #tpu.memory_space<vmem>>, vector<8x1x32xf32>
    %24 = vector.shape_cast %23 : vector<8x1x32xf32> to vector<8x32xf32>
    %25 = vector.shape_cast %22 : vector<8x32xf32> to vector<8x1x32xf32>
    tpu.vector_store %arg2[%c0_1, %c0_2, %c0_3], %25 {strides = array<i32>} : memref<8x1x32xf32, #tpu.memory_space<vmem>>, vector<8x1x32xf32>,
    %26 = vector.broadcast %17 : vector<1x32xf32> to vector<8x32xf32>
    %27 = arith.mulf %26, %7 : vector<8x32xf32>
    %28 = vector.broadcast %16 : vector<1x32xf32> to vector<8x32xf32>
    %29 = arith.mulf %28, %8 : vector<8x32xf32>
    %30 = arith.addf %27, %29 : vector<8x32xf32>
    %c0_4 = arith.constant 0 : index
    %c0_5 = arith.constant 0 : index
    %c0_6 = arith.constant 0 : index
    %31 = vector.load %arg3[%c0_4, %c0_5, %c0_6] : memref<8x1x32xf32, #tpu.memory_space<vmem>>, vector<8x1x32xf32>
    %32 = vector.shape_cast %31 : vector<8x1x32xf32> to vector<8x32xf32>
    %33 = vector.shape_cast %30 : vector<8x32xf32> to vector<8x1x32xf32>
    tpu.vector_store %arg3[%c0_4, %c0_5, %c0_6], %33 {strides = array<i32>} : memref<8x1x32xf32, #tpu.memory_space<vmem>>, vector<8x1x32xf32>,
    return
  }
  func.func @transform_0(%arg0: i32) -> (i32, i32) {
    %c0_i32 = arith.constant 0 : i32
    %c0_i32_0 = arith.constant 0 : i32
    %c0_i32_1 = arith.constant 0 : i32
    return %c0_i32, %c0_i32_0 : i32, i32
  }
  func.func @transform_1(%arg0: i32) -> (i32, i32, i32) {
    %c0_i32 = arith.constant 0 : i32
    %c0_i32_0 = arith.constant 0 : i32
    %c0_i32_1 = arith.constant 0 : i32
    return %arg0, %c0_i32, %c0_i32_0 : i32, i32, i32
  }
  func.func @transform_2(%arg0: i32) -> (i32, i32, i32) {
    %c0_i32 = arith.constant 0 : i32
    %c0_i32_0 = arith.constant 0 : i32
    %c0_i32_1 = arith.constant 0 : i32
    return %arg0, %c0_i32, %c0_i32_0 : i32, i32, i32
  }
}

</mosaic_0001>

<bundles_post_ra>
// kernel: tpu_custom_call.1
= control target key start
LH: loop header
LB: loop body
LE: loop exit
PB: predicated region body
PF: predicated region fallthrough
CT: control target
= control target key end

     0   :  { %8 = vsyncpa [#allocation3], 0  ;;  %s940_s0 = inlined_call_operand.hbm [shape: f32[1,32], index: 0, kind: input, shape index: {}]   ;;  %s941_s1 = inlined_call_operand.hbm [shape: f32[8,1,32], index: 1, kind: output, shape index: {0}]   ;;  %s942_s2 = inlined_call_operand.hbm [shape: f32[8,1,32], index: 2, kind: output, shape index: {1}]  }
   0x1   :  { %9 = vsyncpa [#allocation4], 0 }
   0x2   :  { %10 = vsyncpa [#allocation7], 0  ;;  %s751_s9 = smov [#allocation2]   ;;  %s679_s13 = scalar_lea.hbm %s940_s0, 16 }
   0x3   :  { %s17_s10 = sshll.u32 %s751_s9, 4  ;;  %p680_p0 = scmp.ne.s32.totalorder %s940_s0, %s679_s13  ;;  %s18_s10 = int_to_ptr.vmem [resolvable:$true] %s17_s10 }
   0x4   :  { %p683_p1 = scmp.lt.u32.totalorder %s679_s13, %s940_s0 }
   0x6   :  { %p685_p2 = pnand %p683_p1, %p680_p0 }
   0x8   :  { %688 = shalt.err (!%p685_p2)
}
   0x9   :  { %s689_s18 = scalar_lea.vmem %s18_s10, 16  ;;  %s693_s19 = scalar_lea.vmem %s18_s10, 32 }
   0xa   :  { %p690_p3 = scmp.ne.s32.totalorder %s18_s10, %s689_s18  ;;  %p694_p4 = scmp.lt.s32.totalorder %s18_s10, %s18_s10 }
   0xb   :  { %p695_p5 = scmp.lt.s32.totalorder %s693_s19, %s689_s18 }
   0xd   :  { %p696_p6 = por %p695_p5, %p694_p4 }
   0xf   :  { %p697_p7 = pnand %p696_p6, %p690_p3 }
  0x11   :  { %700 = shalt.err (!%p697_p7)
}
  0x12   :  { %20 = dma.hbm_to_vmem [thread:$0]  %s940_s0, 16, %s18_s10, [#allocation3]  }
  0x13   :  { %745 = dma.done.wait [#allocation3], 16  }
  0x14   :  { %746 = vsyncadd [#allocation3], 4294967280  ;;  %v27_v0 = vlaneseq  ;;  %v24_v5 = vld [vmem:[#allocation2] sm:$0x1]  ;;  %v752_v31 = vmov 683565275  }
  0x15   :  { %v753_v33 = vmov 2475754826   ;;  %v754_v38 = vmov 2131351028   ;;  %v755_v40 = vmov 2102212464  }
  0x16   :  { %v790_v1 = vshrl.u32 %v27_v0, 7  ;;  %v756_v42 = vmov 920167782   ;;  %v757_v50 = vmov 1326507024   ;;  %s759_s0 = smov [#allocation5]  }
  0x17   :  { %s607_s22 = sshll.u32 %s759_s0, 4  ;;  %s760_s23 = smov [#allocation6]   ;;  %s608_s22 = int_to_ptr.vmem [resolvable:$true] %s607_s22 }
  0x18   :  { %v29_v2 = vcvt.s32.f32 %v790_v1  ;;  %v794_v3 = vsub.s32 0, %v790_v1  ;;  %s619_s24 = sshll.u32 %s760_s23, 4  ;;  %s701_s25 = scalar_lea.vmem %s608_s22, 128  ;;  %s907_s24 = int_to_ptr.vmem [resolvable:$true] %s619_s24 }
  0x19   :  { %p702_p8 = scmp.ne.s32.totalorder %s608_s22, %s701_s25  ;;  %p706_p9 = scmp.lt.s32.totalorder %s608_s22, %s608_s22 }
  0x1a   :  { %v244_v4 = vmul.f32 8.0, %v29_v2  ;;  %v34_v6 = vrot.slane %v24_v5, %v794_v3  ;;  %p707_p10 = scmp.lt.s32.totalorder %s701_s25, %s701_s25 }
  0x1c   :  { %v797_v7 = vmul.f32 %v244_v4, %v24_v5  ;;  %v799_v8 = vmul.f32 %v34_v6, %v29_v2  ;;  %p708_p11 = por %p707_p10, %p706_p9 }
  0x1e   :  { %v251_v9 = vand.u32 2139095040, %v797_v7  ;;  %v37_v10 = vand.u32 2147483647, %v799_v8  ;;  %v40_v11 = vand.u32 2139095040, %v799_v8  ;;  %v248_v15 = vand.u32 2147483647, %v797_v7  ;;  %p709_p12 = pnand %p708_p11, %p702_p8 }
  0x1f   :  { %vm39_vm14 = vcmp.lt.s32.totalorder %v799_v8, 0 }
  0x20   :  { %v252_v12 = vshrl.u32 %v251_v9, 23  ;;  %v41_v13 = vshrl.u32 %v40_v11, 23  ;;  %v44_v14 = vand.u32 8388607, %v37_v10  ;;  %v809_v21 = vand.u32 8388607, %v248_v15 }
  0x21   :  { %vm867_vm15 = vcmp.le.f32.partialorder %v37_v10, 0.7853982 }
  0x22   :  { %v643_v16 = vadd.s32 4294967169, %v252_v12  ;;  %v635_v17 = vadd.s32 4294967169, %v41_v13  ;;  %v45_v19 = vor.u32 8388608, %v44_v14  ;;  %v256_v28 = vor.u32 8388608, %v809_v21 }
  0x24   :  { %v258_v18 = vadd.s32 1, %v643_v16  ;;  %v47_v20 = vadd.s32 1, %v635_v17  ;;  %v811_v27 = vshll.u32 %v45_v19, 8 }
  0x26   :  { %vm259_vm0 = vcmp.gt.s32.totalorder %v258_v18, 0  ;;  %vm48_vm1 = vcmp.gt.s32.totalorder %v47_v20, 0 }
  0x27   :  { %v260_v22 = vsel %vm259_vm0, %v258_v18, 0  ;;  %v49_v23 = vsel %vm48_vm1, %v47_v20, 0  ;;  %vm250_vm0 = vcmp.lt.s32.totalorder %v797_v7, 0  ;;  %vm249_vm1 = vcmp.le.f32.partialorder %v248_v15, 0.7853982 }
  0x28   :  { %v262_v24 = vand.u32 31, %v260_v22  ;;  %v50_v25 = vshrl.u32 %v49_v23, 5  ;;  %v51_v26 = vand.u32 31, %v49_v23  ;;  %v814_v29 = vshrl.u32 %v260_v22, 5 }
  0x29   :  { %v758_v15 = vmov 1966171168  }
  0x2a   :  { %v263_v30 = vsub.s32 32, %v262_v24  ;;  %v265_v32 = vshll.u32 %v752_v31, %v262_v24  ;;  %v268_v34 = vshll.u32 %v753_v33, %v262_v24  ;;  %v52_v35 = vsub.s32 32, %v51_v26 }
  0x2b   :  { %v54_v36 = vshll.u32 %v752_v31, %v51_v26  ;;  %v57_v37 = vshll.u32 %v753_v33, %v51_v26  ;;  %v60_v39 = vshll.u32 %v754_v38, %v51_v26  ;;  %v63_v41 = vshll.u32 %v755_v40, %v51_v26 }
  0x2c   :  { %v66_v43 = vshll.u32 %v756_v42, %v51_v26  ;;  %vm69_vm2 = vcmp.lt.s32.totalorder %v50_v25, 1  ;;  %v271_v44 = vshll.u32 %v754_v38, %v262_v24  ;;  %v53_v45 = vshrl.u32 %v752_v31, %v52_v35 }
  0x2d   :  { %v55_v46 = vshrl.u32 %v753_v33, %v52_v35  ;;  %v58_v47 = vshrl.u32 %v754_v38, %v52_v35  ;;  %v61_v48 = vshrl.u32 %v755_v40, %v52_v35  ;;  %v64_v49 = vshrl.u32 %v756_v42, %v52_v35 }
  0x2e   :  { %v67_v51 = vshrl.u32 %v757_v50, %v52_v35  ;;  %vm70_vm3 = vcmp.lt.s32.totalorder %v50_v25, 2  ;;  %vm71_vm4 = vcmp.lt.s32.totalorder %v50_v25, 3  ;;  %vm72_vm5 = vcmp.lt.s32.totalorder %v50_v25, 4 }
  0x2f   :  { %v56_v52 = vor.u32 %v55_v46, %v54_v36  ;;  %v59_v53 = vor.u32 %v58_v47, %v57_v37  ;;  %v62_v54 = vor.u32 %v61_v48, %v60_v39  ;;  %v65_v55 = vor.u32 %v64_v49, %v63_v41 }
  0x30   :  { %v68_v56 = vor.u32 %v67_v51, %v66_v43  ;;  %v266_v57 = vshrl.u32 %v753_v33, %v263_v30  ;;  %v269_v58 = vshrl.u32 %v754_v38, %v263_v30  ;;  %v264_v4 = vshrl.u32 %v752_v31, %v263_v30 }
  0x31   :  { %v73_v59 = vsel %vm69_vm2, %v53_v45, %v56_v52  ;;  %v74_v60 = vsel %vm72_vm5, %v62_v54, 2102212464  ;;  %v77_v61 = vsel %vm69_vm2, %v56_v52, %v59_v53  ;;  %v81_v62 = vsel %vm69_vm2, %v59_v53, %v62_v54 }
  0x32   :  { %v75_v63 = vsel %vm71_vm4, %v59_v53, %v74_v60  ;;  %v78_v0 = vsel %vm72_vm5, %v65_v55, 920167782  ;;  %v82_v2 = vsel %vm72_vm5, %v68_v56, 1326507024  ;;  %v267_v11 = vor.u32 %v266_v57, %v265_v32 }
  0x33   :  { %v76_v5 = vsel %vm70_vm3, %v73_v59, %v75_v63  ;;  %v79_v6 = vsel %vm71_vm4, %v62_v54, %v78_v0  ;;  %v83_v9 = vsel %vm71_vm4, %v65_v55, %v82_v2  ;;  %v270_v14 = vor.u32 %v269_v58, %v268_v34 }
  0x34   :  { %v80_v12 = vsel %vm70_vm3, %v77_v61, %v79_v6  ;;  %v84_v13 = vsel %vm70_vm3, %v81_v62, %v83_v9  ;;  %v272_v16 = vshrl.u32 %v755_v40, %v263_v30  ;;  %v274_v22 = vshll.u32 %v755_v40, %v262_v24 }
  0x35   :  { %v826_v17 = vmul.u32.u64.low %v811_v27, %v84_v13  ;;  %v827_v18 = vmul.u32.u64.high %v811_v27, %v84_v13, %v826_v17  ;;  %v830_v19 = vmul.u32.u64.low %v811_v27, %v80_v12  ;;  %v831_v20 = vmul.u32.u64.high %v811_v27, %v80_v12, %v830_v19 }
  0x36   :  { %v273_v21 = vor.u32 %v272_v16, %v271_v44  ;;  %v275_v23 = vshrl.u32 %v756_v42, %v263_v30  ;;  %v277_v26 = vshll.u32 %v756_v42, %v262_v24  ;;  %v92_v31 = vmul.u32 %v811_v27, %v76_v5 }
  0x37   :  { %v278_v32 = vshrl.u32 %v757_v50, %v263_v30  ;;  %vm280_vm6 = vcmp.lt.s32.totalorder %v814_v29, 1  ;;  %v296_v25 = vshll.u32 %v256_v28, 8  ;;  %vm281_vm7 = vcmp.lt.s32.totalorder %v814_v29, 2 }
  0x38   :  { %v276_v33 = vor.u32 %v275_v23, %v274_v22  ;;  %vm282_vm8 = vcmp.lt.s32.totalorder %v814_v29, 3  ;;  %vm283_vm9 = vcmp.lt.s32.totalorder %v814_v29, 4  ;;  %vm94_vm10 = vc.u32 %v827_v18, %v830_v19 }
  0x39   :  { %v95_v34 = vadd.s32 1, %v831_v20  ;;  %v279_v35 = vor.u32 %v278_v32, %v277_v26  ;;  %v288_v36 = vsel %vm280_vm6, %v267_v11, %v270_v14  ;;  %v284_v24 = vsel %vm280_vm6, %v264_v4, %v267_v11 }
  0x3a   :  { %v285_v37 = vsel %vm283_vm9, %v273_v21, 2102212464  ;;  %v289_v27 = vsel %vm283_vm9, %v276_v33, 920167782  ;;  %v292_v30 = vsel %vm280_vm6, %v270_v14, %v273_v21  ;;  %v93_v2 = vadd.s32 %v830_v19, %v827_v18 }
  0x3b   :  { %v96_v38 = vsel %vm94_vm10, %v95_v34, %v831_v20  ;;  %v286_v28 = vsel %vm282_vm8, %v270_v14, %v285_v37  ;;  %v290_v39 = vsel %vm282_vm8, %v273_v21, %v289_v27  ;;  %v293_v40 = vsel %vm283_vm9, %v279_v35, 1326507024 }
  0x3c   :  { %v97_v41 = vadd.s32 %v96_v38, %v92_v31  ;;  %v291_v42 = vsel %vm281_vm7, %v288_v36, %v290_v39  ;;  %v294_v43 = vsel %vm282_vm8, %v276_v33, %v293_v40  ;;  %v287_v44 = vsel %vm281_vm7, %v284_v24, %v286_v28 }
  0x3d   :  { %v295_v45 = vsel %vm281_vm7, %v292_v30, %v294_v43  ;;  %v853_v46 = vmul.u32.u64.low %v296_v25, %v291_v42  ;;  %v854_v47 = vmul.u32.u64.high %v296_v25, %v291_v42, %v853_v46  ;;  %v303_v52 = vmul.u32 %v296_v25, %v287_v44 }
  0x3e   :  { %v98_v48 = vadd.s32 536870912, %v97_v41  ;;  %v856_v49 = vmul.u32.u64.low %v296_v25, %v295_v45  ;;  %v857_v50 = vmul.u32.u64.high %v296_v25, %v295_v45, %v856_v49  ;;  %vm340_vm10 = vweird.f32 %v797_v7 }
  0x3f   :  { %v306_v53 = vadd.s32 1, %v854_v47 }
  0x40   :  { %v99_v51 = vshrl.u32 %v98_v48, 30  ;;  %vm305_vm11 = vc.u32 %v857_v50, %v853_v46  ;;  %v304_v26 = vadd.s32 %v853_v46, %v857_v50 }
  0x41   :  { %v307_v55 = vsel %vm305_vm11, %v306_v53, %v854_v47 }
  0x42   :  { %v100_v54 = vshll.u32 %v99_v51, 30  ;;  %v308_v57 = vadd.s32 %v307_v55, %v303_v52  ;;  %v123_v38 = vsub.s32 4, %v99_v51 }
  0x44   :  { %v101_v56 = vsub.s32 %v97_v41, %v100_v54  ;;  %v309_v58 = vadd.s32 536870912, %v308_v57  ;;  %v124_v43 = vsel %vm39_vm14, %v123_v38, %v99_v51 }
  0x45   :  { %v126_v45 = vsel %vm867_vm15, 0, %v124_v43 }
  0x46   :  { %v103_v29 = vsub.s32 0, %v101_v56  ;;  %v310_v60 = vshrl.u32 %v309_v58, 30  ;;  %v233_v49 = vadd.s32 3, %v126_v45  ;;  %v130_v54 = vand.u32 3, %v126_v45 }
  0x48   :  { %v636_v59 = vmin.u32 %v103_v29, %v101_v56  ;;  %v311_v62 = vshll.u32 %v310_v60, 30  ;;  %v334_v41 = vsub.s32 4, %v310_v60  ;;  %v234_v55 = vand.u32 3, %v233_v49 }
  0x49   :  { %vm132_vm2 = vcmp.eq.s32.totalorder %v130_v54, 0  ;;  %vm135_vm3 = vcmp.eq.s32.totalorder %v130_v54, 2  ;;  %vm131_vm6 = vcmp.lt.s32.totalorder %v130_v54, 2 }
  0x4a   :  { %v105_v61 = vclz %v636_v59  ;;  %v312_v0 = vsub.s32 %v308_v57, %v311_v62  ;;  %v335_v44 = vsel %vm250_vm0, %v334_v41, %v310_v60  ;;  %vm236_vm4 = vcmp.eq.s32.totalorder %v234_v55, 0 }
  0x4b   :  { %v337_v48 = vsel %vm249_vm1, 0, %v335_v44  ;;  %vm239_vm5 = vcmp.eq.s32.totalorder %v234_v55, 2  ;;  %v469_v59 = vunpack.c.l.s4 %v758_v15  ;;  %vm235_vm7 = vcmp.lt.s32.totalorder %v234_v55, 2 }
  0x4c   :  { %v637_v63 = vadd.s32 4294967294, %v105_v61  ;;  %v314_v5 = vsub.s32 0, %v312_v0  ;;  %v444_v51 = vadd.s32 3, %v337_v48 }
  0x4e   :  { %vm638_vm12 = vcmp.lt.s32.totalorder %v637_v63, 0  ;;  %v644_v12 = vmin.u32 %v314_v5, %v312_v0  ;;  %v445_v57 = vand.u32 3, %v444_v51 }
  0x4f   :  { %v108_v4 = vsel %vm638_vm12, 0, %v637_v63 }
  0x50   :  { %v109_v6 = vsub.s32 32, %v108_v4  ;;  %v110_v9 = vshll.u32 %v101_v56, %v108_v4  ;;  %v113_v11 = vsub.s32 4294967266, %v108_v4  ;;  %v316_v16 = vclz %v644_v12 }
  0x51   :  { %v341_v56 = vand.u32 3, %v337_v48  ;;  %vm450_vm9 = vcmp.eq.s32.totalorder %v445_v57, 2  ;;  %vm447_vm12 = vcmp.eq.s32.totalorder %v445_v57, 0 }
  0x52   :  { %v111_v13 = vshrl.u32 %v93_v2, %v109_v6  ;;  %v114_v14 = vadd.s32 127, %v113_v11  ;;  %v645_v21 = vadd.s32 4294967294, %v316_v16  ;;  %v470_v16 = vunpack.c.0.s8 %v469_v59 }
  0x53   :  { %vm346_vm8 = vcmp.eq.s32.totalorder %v341_v56, 2  ;;  %vm343_vm11 = vcmp.eq.s32.totalorder %v341_v56, 0 }
  0x54   :  { %v112_v17 = vor.u32 %v111_v13, %v110_v9  ;;  %v115_v20 = vshll.u32 %v114_v14, 23  ;;  %vm646_vm13 = vcmp.lt.s32.totalorder %v645_v21, 0 }
  0x55   :  { %v319_v18 = vsel %vm646_vm13, 0, %v645_v21  ;;  %vm129_vm13 = vweird.f32 %v799_v8 }
  0x56   :  { %v116_v22 = vor.u32 4788187, %v115_v20  ;;  %v119_v23 = vcvt.s32.f32 %v112_v17  ;;  %v320_v19 = vsub.s32 32, %v319_v18  ;;  %v321_v32 = vshll.u32 %v312_v0, %v319_v18 }
  0x57   :  { %v324_v25 = vsub.s32 4294967266, %v319_v18  ;;  %v473_v18 = vsub.s32 %v470_v16, %v790_v1 }
  0x58   :  { %v117_v31 = vand.u32 2147483647, %v116_v22  ;;  %v322_v34 = vshrl.u32 %v304_v26, %v320_v19 }
  0x59   :  { %v325_v35 = vadd.s32 127, %v324_v25 }
  0x5a   :  { %v120_v33 = vmul.f32 %v119_v23, %v117_v31  ;;  %v323_v37 = vor.u32 %v322_v34, %v321_v32 }
  0x5b   :  { %v326_v27 = vshll.u32 %v325_v35, 23 }
  0x5c   :  { %v121_v24 = vxor.u32 2147483648, %v120_v33  ;;  %v330_v40 = vcvt.s32.f32 %v323_v37 }
  0x5d   :  { %v327_v39 = vor.u32 4788187, %v326_v27 }
  0x5e   :  { %v122_v30 = vsel %vm39_vm14, %v121_v24, %v120_v33  ;;  %vm342_vm14 = vcmp.lt.s32.totalorder %v341_v56, 2 }
  0x5f   :  { %v125_v28 = vsel %vm867_vm15, %v799_v8, %v122_v30  ;;  %v328_v42 = vand.u32 2147483647, %v327_v39  ;;  %vm446_vm15 = vcmp.lt.s32.totalorder %v445_v57, 2 }
  0x60   :  { %671 = vcosq.f32 %v125_v28 }
  0x61   :  { %673 = vsinq.f32 %v125_v28  ;;  %v331_v10 = vmul.f32 %v330_v40, %v328_v42 }
  0x63   :  { %v332_v46 = vxor.u32 2147483648, %v331_v10 }
  0x65   :  { %v333_v47 = vsel %vm250_vm0, %v332_v46, %v331_v10  ;;  %vm524_vm0 = vcmask 253952  }
  0x66   :  { %v336_v50 = vsel %vm249_vm1, %v797_v7, %v333_v47 }
  0x67   :  { %675 = vcosq.f32 %v336_v50 }
  0x68   :  { %677 = vsinq.f32 %v336_v50 }
  0x6a   :  { %v672_v52 = vpop.eup %671 }
  0x6b   :  { %v674_v53 = vpop.eup %673  ;;  %v136_v58 = vxor.u32 2147483648, %v672_v52 }
  0x6c   :  { %v133_v29 = vxor.u32 2147483648, %v674_v53 }
  0x6d   :  { %v137_v62 = vsel %vm135_vm3, %v136_v58, %v674_v53  ;;  %v241_v0 = vsel %vm239_vm5, %v136_v58, %v674_v53 }
  0x6e   :  { %v134_v61 = vsel %vm132_vm2, %v672_v52, %v133_v29  ;;  %v238_v63 = vsel %vm236_vm4, %v672_v52, %v133_v29 }
  0x6f   :  { %v138_v6 = vsel %vm131_vm6, %v134_v61, %v137_v62  ;;  %v242_v9 = vsel %vm235_vm7, %v238_v63, %v241_v0 }
  0x70   :  { %v139_v21 = vsel %vm129_vm13, nan, %v138_v6  ;;  %v243_v22 = vsel %vm129_vm13, nan, %v242_v9 }
  0x71   :  { %v676_v60 = vpop.eup %675 }
  0x72   :  { %v678_v2 = vpop.eup %677  ;;  %v347_v4 = vxor.u32 2147483648, %v676_v60 }
  0x73   :  { %v344_v5 = vxor.u32 2147483648, %v678_v2 }
  0x74   :  { %v348_v11 = vsel %vm346_vm8, %v347_v4, %v678_v2  ;;  %v452_v12 = vsel %vm450_vm9, %v347_v4, %v678_v2 }
  0x75   :  { %v345_v13 = vsel %vm343_vm11, %v676_v60, %v344_v5  ;;  %v449_v14 = vsel %vm447_vm12, %v676_v60, %v344_v5 }
  0x76   :  { %v349_v17 = vsel %vm342_vm14, %v345_v13, %v348_v11  ;;  %v453_v20 = vsel %vm446_vm15, %v449_v14, %v452_v12 }
  0x77   :  { %v350_v8 = vsel %vm340_vm10, nan, %v349_v17  ;;  %v454_v23 = vsel %vm340_vm10, nan, %v453_v20 }
  0x78   :  { %v458_v26 = vrot.slane %v350_v8, %v794_v3  ;;  %v463_v31 = vrot.slane %v454_v23, %v794_v3 }
  0x7a   :  { %v459_v19 = vmul.f32 %v458_v26, %v139_v21  ;;  %v464_v32 = vmul.f32 %v463_v31, %v243_v22  ;;  %v533_v25 = vmul.f32 %v463_v31, %v139_v21  ;;  %v534_v33 = vmul.f32 %v458_v26, %v243_v22 }
  0x7c   :  { %v465_v34 = vsub.f32 %v459_v19, %v464_v32  ;;  %v535_v35 = vadd.f32 %v534_v33, %v533_v25 }
  0x7e   :  { %v474_v36 = vrot.slane %v465_v34, %v473_v18  ;;  %v467_v24 = vcombine.high %v465_v34, %v465_v34  ;;  %v544_v37 = vrot.slane %v535_v35, %v473_v18  ;;  %v537_v27 = vcombine.high %v535_v35, %v535_v35 }
  0x80   :  { %v490_v30 = vrot.slane %v474_v36, %v473_v18  ;;  %v482_v7 = vcombine.high %v474_v36, %v474_v36  ;;  %v481_v38 = vrot.slane %v467_v24, %v473_v18  ;;  %v560_v28 = vrot.slane %v544_v37, %v473_v18 }
  0x81   :  { %v552_v39 = vcombine.high %v544_v37, %v544_v37  ;;  %v551_v40 = vrot.slane %v537_v27, %v473_v18 }
  0x82   :  { %525 = vst.msk [vmem:[#allocation5] sm:$0x1] %vm524_vm0, %v490_v30  ;;  %v504_v1 = vrot.slane %v482_v7, %v473_v18  ;;  %v512_v3 = vcombine.high %v490_v30, %v490_v30  ;;  %v497_v41 = vrot.slane %v481_v38, %v473_v18  ;;  %v483_v42 = vcombine.high %v481_v38, %v481_v38 }
  0x83   :  { %594 = vst.msk [vmem:[#allocation6] sm:$0x1] %vm524_vm0, %v560_v28  ;;  %v574_v43 = vrot.slane %v552_v39, %v473_v18  ;;  %v582_v10 = vcombine.high %v560_v28, %v560_v28  ;;  %v567_v44 = vrot.slane %v551_v40, %v473_v18  ;;  %v553_v45 = vcombine.high %v551_v40, %v551_v40 }
  0x84   :  { %526 = vst.msk [vmem:[#allocation5 + $0x1] sm:$0x1] %vm524_vm0, %v504_v1  ;;  %527 = vst.msk [vmem:[#allocation5 + $0x2] sm:$0x1] %vm524_vm0, %v512_v3  ;;  %v514_v46 = vcombine.high %v504_v1, %v504_v1  ;;  %v511_v47 = vrot.slane %v483_v42, %v473_v18  ;;  %v513_v48 = vcombine.high %v497_v41, %v497_v41 }
  0x85   :  { %529 = vst.msk [vmem:[#allocation5 + $0x4] sm:$0x1] %vm524_vm0, %v497_v41  ;;  %595 = vst.msk [vmem:[#allocation6 + $0x1] sm:$0x1] %vm524_vm0, %v574_v43  ;;  %v584_v49 = vcombine.high %v574_v43, %v574_v43  ;;  %v581_v50 = vrot.slane %v553_v45, %v473_v18  ;;  %v583_v51 = vcombine.high %v567_v44, %v567_v44 }
  0x86   :  { %596 = vst.msk [vmem:[#allocation6 + $0x2] sm:$0x1] %vm524_vm0, %v582_v10  ;;  %598 = vst.msk [vmem:[#allocation6 + $0x4] sm:$0x1] %vm524_vm0, %v567_v44  ;;  %v515_v52 = vcombine.high %v511_v47, %v511_v47 }
  0x87   :  { %528 = vst.msk [vmem:[#allocation5 + $0x3] sm:$0x1] %vm524_vm0, %v514_v46  ;;  %530 = vst.msk [vmem:[#allocation5 + $0x5] sm:$0x1] %vm524_vm0, %v511_v47  ;;  %v585_v53 = vcombine.high %v581_v50, %v581_v50 }
  0x88   :  { %531 = vst.msk [vmem:[#allocation5 + $0x6] sm:$0x1] %vm524_vm0, %v513_v48  ;;  %597 = vst.msk [vmem:[#allocation6 + $0x3] sm:$0x1] %vm524_vm0, %v584_v49 }
  0x89   :  { %599 = vst.msk [vmem:[#allocation6 + $0x5] sm:$0x1] %vm524_vm0, %v581_v50  ;;  %600 = vst.msk [vmem:[#allocation6 + $0x6] sm:$0x1] %vm524_vm0, %v583_v51 }
  0x8a   :  { %532 = vst.msk [vmem:[#allocation5 + $0x7] sm:$0x1] %vm524_vm0, %v515_v52  ;;  %601 = vst.msk [vmem:[#allocation6 + $0x7] sm:$0x1] %vm524_vm0, %v585_v53 }
  0x8b   :  { %712 = shalt.err (!%p709_p12)
}
  0x8c   :  { %s713_s28 = scalar_lea.hbm %s941_s1, 128 }
  0x8d   :  { %p714_p13 = scmp.ne.s32.totalorder %s941_s1, %s713_s28  ;;  %p717_p0 = scmp.lt.u32.totalorder %s713_s28, %s941_s1 }
  0x8f   :  { %p719_p1 = pnand %p717_p0, %p714_p13 }
  0x91   :  { %722 = shalt.err (!%p719_p1)
}
  0x92   :  { %s761_s5 = smov 16   ;;  %s762_s6 = smov 1  }
  0x93   :  { %613 = dma.vmem_to_hbm [thread:$0]  %s608_s22, 128, %s941_s1, [#allocation4], %s761_s5, %s761_s5, %s762_s6  }
  0x94   :  { %s723_s9 = scalar_lea.vmem %s907_s24, 128  ;;  %p728_p3 = scmp.lt.s32.totalorder %s907_s24, %s907_s24 }
  0x95   :  { %p724_p2 = scmp.ne.s32.totalorder %s907_s24, %s723_s9  ;;  %p729_p4 = scmp.lt.s32.totalorder %s723_s9, %s723_s9 }
  0x97   :  { %p730_p5 = por %p729_p4, %p728_p3 }
  0x99   :  { %p731_p6 = pnand %p730_p5, %p724_p2 }
  0x9b   :  { %734 = shalt.err (!%p731_p6)
}
  0x9c   :  { %s735_s12 = scalar_lea.hbm %s942_s2, 128 }
  0x9d   :  { %p736_p7 = scmp.ne.s32.totalorder %s942_s2, %s735_s12  ;;  %p739_p8 = scmp.lt.u32.totalorder %s735_s12, %s942_s2 }
  0x9f   :  { %p741_p9 = pnand %p739_p8, %p736_p7 }
  0xa1   :  { %744 = shalt.err (!%p741_p9)
}
  0xa2   :  { %625 = dma.vmem_to_hbm [thread:$0]  %s907_s24, 128, %s942_s2, [#allocation7], %s761_s5, %s761_s5, %s762_s6  }
  0xa3   :  { %747 = dma.done.wait [#allocation4], 128  }
  0xa4   :  { %748 = vsyncadd [#allocation4], 4294967168 }
  0xa5   :  { %749 = dma.done.wait [#allocation7], 128  }
  0xa6   :  { %750 = vsyncadd [#allocation7], 4294967168 }
  0xa7   :  { %632 = vsyncpa [#allocation3], 1 }
  0xa8   :  { %633 = vsyncpa [#allocation4], 1 }
  0xa9   :  { %634 = vsyncpa [#allocation7], 1 }

</bundles_post_ra>
